<compile_context>
chip_gen: v7x
topology: tpu7x:2x2x1
jax: 0.10.0
libtpu: 0.0.40
codegen_flags: <defaults>
</compile_context>

<pallas_src>
import jax
import jax.numpy as jnp
from jax.experimental import pallas as pl
from jax.experimental.pallas import tpu as pltpu

_LANE = 128
_SUBLANE = 8
# Max rows per feature tile: 4096 * 128 * 4B = 2 MiB per f32 input buffer.
# (x2 double buffering + two f32 accumulators ~= 8.5 MiB VMEM -> fits the v5e
#  16 MiB scoped default and leaves ample headroom on v6e / v7x.)
_MAX_TILE_ROWS = 4096
_PAD_VALUE = -1e4  # sigmoid(-1e4) == 0 exactly in f32 -> padding contributes nothing


def _soft_dice_kernel(x_ref, inter_ref, sum_ref, inter_acc, sum_acc):
    """Grid = (batch, feature_tiles).

    x_ref     : (1, TS, 128)  logits tile (one batch row, contiguous slab)
    inter_ref : (1, 1, 128)   per-batch lane-partial sums of sigmoid(x)^2
    sum_ref   : (1, 1, 128)   per-batch lane-partial sums of sigmoid(x)
    inter_acc : (TS, 128)     elementwise f32 accumulator (VMEM scratch)
    sum_acc   : (TS, 128)     elementwise f32 accumulator (VMEM scratch)
    """
    k = pl.program_id(1)

    @pl.when(k == 0)
    def _init():
        inter_acc[...] = jnp.zeros_like(inter_acc)
        sum_acc[...] = jnp.zeros_like(sum_acc)

    x = x_ref[0].astype(jnp.float32)           # (TS, 128)
    # sigmoid(x) = 0.5 * tanh(0.5 * x) + 0.5 : a single EUP op instead of exp+divide.
    p = 0.5 * jnp.tanh(0.5 * x) + 0.5
    # Steady state: pure elementwise VPU adds; all reductions deferred to finalize.
    inter_acc[...] += p * p
    sum_acc[...] += p

    @pl.when(k == pl.num_programs(1) - 1)
    def _finalize():
        inter_ref[...] = jnp.sum(
            inter_acc[...], axis=0, keepdims=True).reshape(1, 1, _LANE)
        sum_ref[...] = jnp.sum(
            sum_acc[...], axis=0, keepdims=True).reshape(1, 1, _LANE)


@jax.jit
def soft_dice_loss(logits, targets):
    """Matches SoftDiceLoss().forward(logits, targets) from the PyTorch module.

    `targets` participates only through its leading batch dimension, exactly as
    in the reference implementation.
    """
    assert logits.shape[0] == targets.shape[0]
    B = logits.shape[0]
    x = logits.reshape(B, -1)            # torch .view(num, -1), row-major flatten
    F = x.shape[1]

    # --- tiling: sublane/lane-dense (TS, 128) blocks of each batch row ---------
    rows = -(-F // _LANE)                           # ceil(F / 128)
    n_tiles = max(1, -(-rows // _MAX_TILE_ROWS))    # number of feature tiles
    ts = -(-rows // n_tiles)                        # rows per tile
    ts = -(-ts // _SUBLANE) * _SUBLANE              # round up to sublane multiple
    rows_pad = n_tiles * ts
    f_pad = rows_pad * _LANE

    if f_pad != F:
        # sigmoid(_PAD_VALUE) == 0 exactly -> no correction needed.
        x = jnp.pad(x, ((0, 0), (0, f_pad - F)), constant_values=_PAD_VALUE)
    # Keep the HBM-side dtype as-is (bf16 stays bf16); the kernel casts to f32.
    x3 = x.reshape(B, rows_pad, _LANE)

    itemsize = x3.dtype.itemsize
    vmem_bytes = (2 * ts * _LANE * itemsize      # double-buffered input tile
                  + 2 * ts * _LANE * 4           # two f32 accumulators
                  + 2 * 2 * _LANE * 4)           # double-buffered (1,1,128) outputs
    vmem_limit = int(min(max(2 * vmem_bytes, 8 * 1024 * 1024), 32 * 1024 * 1024))

    inter_p, sum_p = pl.pallas_call(
        _soft_dice_kernel,
        out_shape=(
            jax.ShapeDtypeStruct((B, 1, _LANE), jnp.float32),
            jax.ShapeDtypeStruct((B, 1, _LANE), jnp.float32),
        ),
        grid_spec=pltpu.PrefetchScalarGridSpec(
            num_scalar_prefetch=0,
            grid=(B, n_tiles),
            in_specs=[pl.BlockSpec((1, ts, _LANE), lambda b, k: (b, k, 0))],
            out_specs=[
                pl.BlockSpec((1, 1, _LANE), lambda b, k: (b, 0, 0)),
                pl.BlockSpec((1, 1, _LANE), lambda b, k: (b, 0, 0)),
            ],
            scratch_shapes=[
                pltpu.VMEM((ts, _LANE), jnp.float32),
                pltpu.VMEM((ts, _LANE), jnp.float32),
            ],
        ),
        compiler_params=pltpu.CompilerParams(
            dimension_semantics=("parallel", "arbitrary"),
            vmem_limit_bytes=vmem_limit,
        ),
        cost_estimate=pl.CostEstimate(
            flops=6 * B * f_pad,
            transcendentals=B * f_pad,
            bytes_accessed=B * f_pad * itemsize + 2 * B * _LANE * 4,
        ),
    )(x3)

    # Tiny final combine in plain JAX: lane reduction + dice/loss arithmetic.
    smooth = 1.0
    inter = jnp.sum(inter_p.reshape(B, _LANE), axis=1)   # (B,) sum of sigmoid(x)^2
    s = jnp.sum(sum_p.reshape(B, _LANE), axis=1)         # (B,) sum of sigmoid(x)
    dice = 2.0 * (inter + smooth) / (s + s + smooth)
    return 1.0 - jnp.sum(dice) / B


def _reference(logits, targets):
    """Pure-JAX reference mirroring the PyTorch code."""
    B = targets.shape[0]
    smooth = 1.0
    probs = jax.nn.sigmoid(logits.astype(jnp.float32)).reshape(B, -1)
    m1 = probs
    m2 = probs
    intersection = (m1 * m2).sum(axis=1)
    dice_coeff = 2.0 * (intersection + smooth) / (m1.sum(1) + m2.sum(1) + smooth)
    return 1.0 - dice_coeff.sum() / B


if __name__ == "__main__":
    key = jax.random.PRNGKey(0)
    k1, k2, k3, k4 = jax.random.split(key, 4)

    # Case 1: small aligned shape (F = 4*16*16 = 1024, no padding path).
    B, C, H, W = 2, 4, 16, 16
    logits = jax.random.normal(k1, (B, C, H, W), dtype=jnp.float32)
    targets = (jax.random.uniform(k2, (B, C, H, W)) > 0.5).astype(jnp.float32)
    loss = soft_dice_loss(logits, targets)
    jax.block_until_ready(loss)
    ref = _reference(logits, targets)
    assert jnp.allclose(loss, ref, atol=5e-5, rtol=5e-5), (loss, ref)

    # Case 2: F not a multiple of 128 (exercises the padding path).
    B2, C2, H2, W2 = 2, 3, 10, 10
    logits2 = jax.random.normal(k3, (B2, C2, H2, W2), dtype=jnp.float32)
    targets2 = (jax.random.uniform(k4, (B2, C2, H2, W2)) > 0.5).astype(jnp.float32)
    loss2 = soft_dice_loss(logits2, targets2)
    jax.block_until_ready(loss2)
    ref2 = _reference(logits2, targets2)
    assert jnp.allclose(loss2, ref2, atol=5e-5, rtol=5e-5), (loss2, ref2)

    print("KERNEL_OK")
</pallas_src>

<mosaic_0001>
module attributes {stable_mosaic.version = 11 : i64} {
  func.func @_soft_dice_kernel(%arg0: i32, %arg1: i32, %arg2: memref<1x8x128xf32, #tpu.memory_space<vmem>>, %arg3: memref<1x1x128xf32, #tpu.memory_space<vmem>>, %arg4: memref<1x1x128xf32, #tpu.memory_space<vmem>>, %arg5: memref<8x128xf32, #tpu.memory_space<vmem>>, %arg6: memref<8x128xf32, #tpu.memory_space<vmem>>) attributes {dimension_semantics = [#tpu.dimension_semantics<parallel>, #tpu.dimension_semantics<arbitrary>], iteration_bounds = array<i64: 2, 1>, scalar_prefetch = 0 : i64, scratch_operands = 2 : i64, tpu.core_type = #tpu.core_type<tc>, window_params = [{transform_indices = @transform_0, window_bounds = array<i64: 1, 8, 128>}, {transform_indices = @transform_1, window_bounds = array<i64: 1, 1, 128>}, {transform_indices = @transform_2, window_bounds = array<i64: 1, 1, 128>}]} {
    %c0_i32 = arith.constant 0 : i32
    %0 = arith.cmpi eq, %arg1, %c0_i32 : i32
    %1 = arith.extui %0 : i1 to i32
    %c0_i32_0 = arith.constant 0 : i32
    %2 = arith.cmpi ne, %1, %c0_i32_0 : i32
    scf.if %2 {
      %cst_15 = arith.constant 0.000000e+00 : f32
      %22 = vector.broadcast %cst_15 : f32 to vector<8x128xf32>
      %c0_16 = arith.constant 0 : index
      %c0_17 = arith.constant 0 : index
      %23 = vector.load %arg5[%c0_16, %c0_17] : memref<8x128xf32, #tpu.memory_space<vmem>>, vector<8x128xf32>
      tpu.vector_store %arg5[%c0_16, %c0_17], %22 {strides = array<i32>} : memref<8x128xf32, #tpu.memory_space<vmem>>, vector<8x128xf32>,
      %cst_18 = arith.constant 0.000000e+00 : f32
      %24 = vector.broadcast %cst_18 : f32 to vector<8x128xf32>
      %c0_19 = arith.constant 0 : index
      %c0_20 = arith.constant 0 : index
      %25 = vector.load %arg6[%c0_19, %c0_20] : memref<8x128xf32, #tpu.memory_space<vmem>>, vector<8x128xf32>
      tpu.vector_store %arg6[%c0_19, %c0_20], %24 {strides = array<i32>} : memref<8x128xf32, #tpu.memory_space<vmem>>, vector<8x128xf32>,
    } else {
    }
    %c0 = arith.constant 0 : index
    %c0_1 = arith.constant 0 : index
    %c0_2 = arith.constant 0 : index
    %3 = vector.load %arg2[%c0, %c0_1, %c0_2] : memref<1x8x128xf32, #tpu.memory_space<vmem>>, vector<1x8x128xf32>
    %4 = vector.shape_cast %3 : vector<1x8x128xf32> to vector<8x128xf32>
    %cst = arith.constant 5.000000e-01 : f32
    %5 = vector.broadcast %cst : f32 to vector<8x128xf32>
    %6 = arith.mulf %5, %4 : vector<8x128xf32>
    %7 = math.tanh %6 : vector<8x128xf32>
    %cst_3 = arith.constant 5.000000e-01 : f32
    %8 = vector.broadcast %cst_3 : f32 to vector<8x128xf32>
    %9 = arith.mulf %8, %7 : vector<8x128xf32>
    %cst_4 = arith.constant 5.000000e-01 : f32
    %10 = vector.broadcast %cst_4 : f32 to vector<8x128xf32>
    %11 = arith.addf %9, %10 : vector<8x128xf32>
    %c0_5 = arith.constant 0 : index
    %c0_6 = arith.constant 0 : index
    %12 = vector.load %arg5[%c0_5, %c0_6] : memref<8x128xf32, #tpu.memory_space<vmem>>, vector<8x128xf32>
    %13 = arith.mulf %11, %11 : vector<8x128xf32>
    %14 = arith.addf %12, %13 : vector<8x128xf32>
    %c0_7 = arith.constant 0 : index
    %c0_8 = arith.constant 0 : index
    %15 = vector.load %arg5[%c0_7, %c0_8] : memref<8x128xf32, #tpu.memory_space<vmem>>, vector<8x128xf32>
    tpu.vector_store %arg5[%c0_7, %c0_8], %14 {strides = array<i32>} : memref<8x128xf32, #tpu.memory_space<vmem>>, vector<8x128xf32>,
    %c0_9 = arith.constant 0 : index
    %c0_10 = arith.constant 0 : index
    %16 = vector.load %arg6[%c0_9, %c0_10] : memref<8x128xf32, #tpu.memory_space<vmem>>, vector<8x128xf32>
    %17 = arith.addf %16, %11 : vector<8x128xf32>
    %c0_11 = arith.constant 0 : index
    %c0_12 = arith.constant 0 : index
    %18 = vector.load %arg6[%c0_11, %c0_12] : memref<8x128xf32, #tpu.memory_space<vmem>>, vector<8x128xf32>
    tpu.vector_store %arg6[%c0_11, %c0_12], %17 {strides = array<i32>} : memref<8x128xf32, #tpu.memory_space<vmem>>, vector<8x128xf32>,
    %c0_i32_13 = arith.constant 0 : i32
    %19 = arith.cmpi eq, %arg1, %c0_i32_13 : i32
    %20 = arith.extui %19 : i1 to i32
    %c0_i32_14 = arith.constant 0 : i32
    %21 = arith.cmpi ne, %20, %c0_i32_14 : i32
    scf.if %21 {
      %c0_15 = arith.constant 0 : index
      %c0_16 = arith.constant 0 : index
      %22 = vector.load %arg5[%c0_15, %c0_16] : memref<8x128xf32, #tpu.memory_space<vmem>>, vector<8x128xf32>
      %cst_17 = arith.constant dense<0.000000e+00> : vector<128xf32>
      %23 = vector.multi_reduction <add>, %22, %cst_17 [0] : vector<8x128xf32> to vector<128xf32>
      %24 = vector.shape_cast %23 : vector<128xf32> to vector<1x128xf32>
      %25 = vector.shape_cast %24 : vector<1x128xf32> to vector<1x1x128xf32>
      %c0_18 = arith.constant 0 : index
      %c0_19 = arith.constant 0 : index
      %c0_20 = arith.constant 0 : index
      %26 = vector.load %arg3[%c0_18, %c0_19, %c0_20] : memref<1x1x128xf32, #tpu.memory_space<vmem>>, vector<1x1x128xf32>
      tpu.vector_store %arg3[%c0_18, %c0_19, %c0_20], %25 {strides = array<i32>} : memref<1x1x128xf32, #tpu.memory_space<vmem>>, vector<1x1x128xf32>,
      %c0_21 = arith.constant 0 : index
      %c0_22 = arith.constant 0 : index
      %27 = vector.load %arg6[%c0_21, %c0_22] : memref<8x128xf32, #tpu.memory_space<vmem>>, vector<8x128xf32>
      %cst_23 = arith.constant dense<0.000000e+00> : vector<128xf32>
      %28 = vector.multi_reduction <add>, %27, %cst_23 [0] : vector<8x128xf32> to vector<128xf32>
      %29 = vector.shape_cast %28 : vector<128xf32> to vector<1x128xf32>
      %30 = vector.shape_cast %29 : vector<1x128xf32> to vector<1x1x128xf32>
      %c0_24 = arith.constant 0 : index
      %c0_25 = arith.constant 0 : index
      %c0_26 = arith.constant 0 : index
      %31 = vector.load %arg4[%c0_24, %c0_25, %c0_26] : memref<1x1x128xf32, #tpu.memory_space<vmem>>, vector<1x1x128xf32>
      tpu.vector_store %arg4[%c0_24, %c0_25, %c0_26], %30 {strides = array<i32>} : memref<1x1x128xf32, #tpu.memory_space<vmem>>, vector<1x1x128xf32>,
    } else {
    }
    return
  }
  func.func @transform_0(%arg0: i32, %arg1: i32) -> (i32, i32, i32) {
    %c0_i32 = arith.constant 0 : i32
    %c0_i32_0 = arith.constant 0 : i32
    return %arg0, %arg1, %c0_i32 : i32, i32, i32
  }
  func.func @transform_1(%arg0: i32, %arg1: i32) -> (i32, i32, i32) {
    %c0_i32 = arith.constant 0 : i32
    %c0_i32_0 = arith.constant 0 : i32
    %c0_i32_1 = arith.constant 0 : i32
    return %arg0, %c0_i32, %c0_i32_0 : i32, i32, i32
  }
  func.func @transform_2(%arg0: i32, %arg1: i32) -> (i32, i32, i32) {
    %c0_i32 = arith.constant 0 : i32
    %c0_i32_0 = arith.constant 0 : i32
    %c0_i32_1 = arith.constant 0 : i32
    return %arg0, %c0_i32, %c0_i32_0 : i32, i32, i32
  }
}

</mosaic_0001>

<bundles_post_ra>
// kernel: soft_dice_loss.1
= control target key start
LH: loop header
LB: loop body
LE: loop exit
PB: predicated region body
PF: predicated region fallthrough
CT: control target
= control target key end

     0   :  { %s362_s9 = smov 0   ;;  %s364_s10 = smov 0   ;;  %s398_s0 = inlined_call_operand.vmem [shape: f32[2,8,128], index: 0, kind: input, shape index: {}]   ;;  %s399_s1 = inlined_call_operand.vmem [shape: f32[2,1,128], index: 1, kind: output, shape index: {0}]   ;;  %s400_s2 = inlined_call_operand.vmem [shape: f32[2,1,128], index: 2, kind: output, shape index: {1}]  }
   0x1   :  { %s366_s11 = smov 0  }
   0x2 LB: > { %s25_s12 = sadd.s32 1, %s341_s10  ;;  %p293_p0 = scmp.ge.s32.totalorder %s345_s11, 1  ;;  %s345_s11 = sphi %s366_s11, %s13_s11   ;;  %s341_s10 = sphi %s364_s10, %s402_s10   ;;  %s337_s9 = sphi %s362_s9, %s401_s9  }
   0x3   : > { %p27_p1 = scmp.ge.s32.totalorder %s25_s12, 2  ;;  %p131_p2 = scmp.lt.s32.totalorder %s345_s11, 3 }
   0x5   : > { %s404_s12 = smov (%p27_p1, %s25_s12), 0  ;;  %p132_p3 = pnand %p293_p0, %p131_p2 }
   0x6   : > { %p156_p4 = scmp.lt.s32.totalorder (!%p132_p3), %s337_s9, 1 }
   0x7   : > { %135 = sbr.rel (%p132_p3) target bundleno = 50 (0x32), region = 24 }
   0xe   : > { %s406_s9 = smov (!%p156_p4, %s337_s9), 1 }
   0xf   : > { %s294_s13 = sshll.u32 %s406_s9, 3  ;;  %s168_s19 = scalar_lea.vmem %s400_s2, %s406_s9 }
  0x10   : > { %s162_s16 = scalar_lea.vmem %s398_s0, %s294_s13  ;;  %s165_s22 = scalar_lea.vmem %s399_s1, %s406_s9 }
  0x11   : > { %v175_v0 = vld [vmem:[%s162_s16] sm:$0xff] }
  0x12   : > { %v176_v1 = vmul.f32 0.5, %v175_v0 }
  0x14   : > { %321 = vtanh.f32 %v176_v1 }
  0x1e   : > { %v322_v2 = vpop.eup %321 }
  0x1f   : > { %v178_v3 = vmul.f32 0.5, %v322_v2 }
  0x21   : > { %v179_v4 = vadd.f32 0.5, %v178_v3 }
  0x23   : > { %v181_v5 = vmul.f32 %v179_v4, %v179_v4  ;;  %v199_v6 = vrot.slane %v179_v4, 4 }
  0x25   : > { %v191_v7 = vrot.slane %v181_v5, 4  ;;  %v200_v8 = vadd.f32 %v199_v6, %v179_v4 }
  0x27   : > { %v192_v9 = vadd.f32 %v191_v7, %v181_v5  ;;  %v201_v10 = vrot.slane %v200_v8, 2 }
  0x29   : > { %v193_v11 = vrot.slane %v192_v9, 2  ;;  %v202_v12 = vadd.f32 %v201_v10, %v200_v8 }
  0x2b   : > { %v194_v13 = vadd.f32 %v193_v11, %v192_v9  ;;  %v203_v14 = vrot.slane %v202_v12, 1 }
  0x2d   : > { %v195_v15 = vrot.slane %v194_v13, 1  ;;  %v204_v16 = vadd.f32 %v203_v14, %v202_v12 }
  0x2f   : > { %v196_v17 = vadd.f32 %v195_v15, %v194_v13  ;;  %205 = vst [vmem:[%s168_s19] sm:$0x1] %v204_v16 }
  0x31   : > { %197 = vst [vmem:[%s165_s22] sm:$0x1] %v196_v17 }
  0x32 PF: > { %s13_s11 = sadd.s32 1, %s345_s11   ;;  %s401_s9 = smov %s341_s10 }
  0x33   : > { %p10_p5 = scmp.ge.s32.totalorder %s13_s11, 4   ;;  %s402_s10 = smov %s404_s12 }
  0x35   :  { %12 = sbr.rel (!%p10_p5) target bundleno = 2 (0x2), region = 74 }

</bundles_post_ra>
